<compile_context>
chip_gen: v7x
topology: tpu7x:2x2x1
jax: 0.10.0
libtpu: 0.0.40
codegen_flags: <defaults>
</compile_context>

<pallas_src>
import jax
import jax.numpy as jnp
from jax.experimental import pallas as pl
from jax.experimental.pallas import tpu as pltpu

# Module hyper-parameters (consistent with the nn.Module defaults used here).
MODEL_INPUT_SIZE = 64
MODEL_OUTPUT_SIZE = 16
MODEL_ARCHITECTURE = (128, 64, 32)
BATCH = 8

DIMS = [MODEL_INPUT_SIZE, *MODEL_ARCHITECTURE, MODEL_OUTPUT_SIZE]  # [64,128,64,32,16]
PAD = 128               # lane-dense feature width for every layer
N_LAYERS = 4
LEAKY_SLOPE = 0.01      # F.leaky_relu default negative_slope


def dqn_kernel(x_ref, w_ref, b_ref, o_ref):
    """Fused forward pass.

    x_ref: (B, 128)      f32  — input, cols >= 64 padded with 1.0 (log -> 0)
    w_ref: (4, 128, 128) bf16 — zero-padded, transposed (in, out) weights
    b_ref: (4, 128)      f32  — zero-padded biases
    o_ref: (B, 128)      f32  — padded output (real values in cols [0, 16))
    """
    # Input is required to be strictly positive (torch.log semantics).
    h = jnp.log(x_ref[...])                                   # f32 (B, 128)

    for l in range(N_LAYERS):
        w = w_ref[l]                                          # (128, 128) bf16
        b = b_ref[pl.ds(l, 1), :]                             # (1, 128)   f32
        h = jnp.dot(h.astype(jnp.bfloat16), w,
                    preferred_element_type=jnp.float32) + b   # f32 (B, 128)
        if l < N_LAYERS - 1:
            # leaky_relu(x) = max(x, slope*x) for slope in [0, 1]
            h = jnp.maximum(h, LEAKY_SLOPE * h)

    o_ref[...] = h


@jax.jit
def deep_q_network(x, w_packed, b_packed):
    """x: (B, 64) f32 strictly positive.  Returns (B, 16) f32."""
    B = x.shape[0]

    # Lane-pad x to 128 with ones: log(1) == 0, and the corresponding weight
    # rows are zero-padded, so padded lanes contribute exactly 0.
    x_pad = jnp.pad(x, ((0, 0), (0, PAD - x.shape[1])), constant_values=1.0)

    cost = pl.CostEstimate(
        flops=2 * B * sum(DIMS[i] * DIMS[i + 1] for i in range(N_LAYERS)),
        transcendentals=B * MODEL_INPUT_SIZE,                  # the log()
        bytes_accessed=(x_pad.size * 4 + w_packed.size * 2
                        + b_packed.size * 4 + B * PAD * 4),
    )

    out_pad = pl.pallas_call(
        dqn_kernel,
        out_shape=jax.ShapeDtypeStruct((B, PAD), jnp.float32),
        in_specs=[
            pl.BlockSpec(memory_space=pltpu.MemorySpace.VMEM),  # x
            pl.BlockSpec(memory_space=pltpu.MemorySpace.VMEM),  # packed weights
            pl.BlockSpec(memory_space=pltpu.MemorySpace.VMEM),  # packed biases
        ],
        out_specs=pl.BlockSpec(memory_space=pltpu.MemorySpace.VMEM),
        cost_estimate=cost,
    )(x_pad, w_packed, b_packed)

    return out_pad[:, :MODEL_OUTPUT_SIZE]


def init_params(key):
    """PyTorch-like uniform fan-in init; weights stored transposed (in, out)."""
    params = {}
    for i in range(N_LAYERS):
        key, kw, kb = jax.random.split(key, 3)
        bound = 1.0 / (DIMS[i] ** 0.5)
        params[f"w{i + 1}_t"] = jax.random.uniform(
            kw, (DIMS[i], DIMS[i + 1]), jnp.float32, -bound, bound)
        params[f"b{i + 1}"] = jax.random.uniform(
            kb, (DIMS[i + 1],), jnp.float32, -bound, bound)
    return params


def pack_params(params):
    """Pack all layers into one bf16 weight slab + one f32 bias slab."""
    w_packed = jnp.zeros((N_LAYERS, PAD, PAD), jnp.float32)
    b_packed = jnp.zeros((N_LAYERS, PAD), jnp.float32)
    for l in range(N_LAYERS):
        w = params[f"w{l + 1}_t"]      # (in, out)
        b = params[f"b{l + 1}"]        # (out,)
        w_packed = w_packed.at[l, :w.shape[0], :w.shape[1]].set(w)
        b_packed = b_packed.at[l, :b.shape[0]].set(b)
    return w_packed.astype(jnp.bfloat16), b_packed


def ref_forward(x, params):
    """Pure-JAX reference using the same bf16-rounded matmul inputs."""
    h = jnp.log(x)
    for l in range(1, N_LAYERS + 1):
        w = params[f"w{l}_t"].astype(jnp.bfloat16).astype(jnp.float32)
        hb = h.astype(jnp.bfloat16).astype(jnp.float32)
        h = hb @ w + params[f"b{l}"]
        if l < N_LAYERS:
            h = jnp.maximum(h, LEAKY_SLOPE * h)
    return h


if __name__ == "__main__":
    key = jax.random.PRNGKey(0)
    key, k_x, k_p = jax.random.split(key, 3)

    # Inputs must be strictly positive (torch.log in the forward).
    x = jax.random.uniform(k_x, (BATCH, MODEL_INPUT_SIZE), jnp.float32,
                           minval=0.1, maxval=2.0)

    params = init_params(k_p)
    w_packed, b_packed = pack_params(params)

    out = deep_q_network(x, w_packed, b_packed)
    jax.block_until_ready(out)

    ref_out = ref_forward(x, params)
    assert out.shape == (BATCH, MODEL_OUTPUT_SIZE)
    max_err = float(jnp.max(jnp.abs(out - ref_out)))
    assert jnp.allclose(out, ref_out, atol=1e-3, rtol=1e-3), max_err

    print("KERNEL_OK")
</pallas_src>

<mosaic_0001>
module attributes {stable_mosaic.version = 11 : i64} {
  func.func @dqn_kernel(%arg0: memref<8x128xf32, #tpu.memory_space<vmem>>, %arg1: memref<4x128x128xbf16, #tpu.memory_space<vmem>>, %arg2: memref<4x128xf32, #tpu.memory_space<vmem>>, %arg3: memref<8x128xf32, #tpu.memory_space<vmem>>) attributes {dimension_semantics = [], scalar_prefetch = 0 : i64, scratch_operands = 0 : i64, tpu.core_type = #tpu.core_type<tc>} {
    %c0 = arith.constant 0 : index
    %c0_0 = arith.constant 0 : index
    %0 = vector.load %arg0[%c0, %c0_0] : memref<8x128xf32, #tpu.memory_space<vmem>>, vector<8x128xf32>
    %1 = math.log %0 : vector<8x128xf32>
    %c0_1 = arith.constant 0 : index
    %c0_2 = arith.constant 0 : index
    %c0_3 = arith.constant 0 : index
    %2 = vector.load %arg1[%c0_1, %c0_2, %c0_3] : memref<4x128x128xbf16, #tpu.memory_space<vmem>>, vector<1x128x128xbf16>
    %3 = vector.shape_cast %2 : vector<1x128x128xbf16> to vector<128x128xbf16>
    %c0_4 = arith.constant 0 : index
    %c0_5 = arith.constant 0 : index
    %4 = vector.load %arg2[%c0_4, %c0_5] : memref<4x128xf32, #tpu.memory_space<vmem>>, vector<1x128xf32>
    %5 = arith.truncf %1 : vector<8x128xf32> to vector<8x128xbf16>
    %cst = arith.constant dense<0.000000e+00> : vector<8x128xf32>
    %6 = tpu.matmul %5, %3, %cst {dimension_numbers = #tpu.dot_dimension_numbers<[1], [0], [0], [1], [0, 0, 1, 1], [], []>} : vector<8x128xbf16>, vector<128x128xbf16>, vector<8x128xf32> -> vector<8x128xf32>
    %7 = vector.broadcast %4 : vector<1x128xf32> to vector<8x128xf32>
    %8 = arith.addf %6, %7 : vector<8x128xf32>
    %cst_6 = arith.constant 0.00999999977 : f32
    %9 = vector.broadcast %cst_6 : f32 to vector<8x128xf32>
    %10 = arith.mulf %9, %8 : vector<8x128xf32>
    %11 = arith.maximumf %8, %10 : vector<8x128xf32>
    %c1 = arith.constant 1 : index
    %c0_7 = arith.constant 0 : index
    %c0_8 = arith.constant 0 : index
    %12 = vector.load %arg1[%c1, %c0_7, %c0_8] : memref<4x128x128xbf16, #tpu.memory_space<vmem>>, vector<1x128x128xbf16>
    %13 = vector.shape_cast %12 : vector<1x128x128xbf16> to vector<128x128xbf16>
    %c1_9 = arith.constant 1 : index
    %c0_10 = arith.constant 0 : index
    %14 = vector.load %arg2[%c1_9, %c0_10] : memref<4x128xf32, #tpu.memory_space<vmem>>, vector<1x128xf32>
    %15 = arith.truncf %11 : vector<8x128xf32> to vector<8x128xbf16>
    %cst_11 = arith.constant dense<0.000000e+00> : vector<8x128xf32>
    %16 = tpu.matmul %15, %13, %cst_11 {dimension_numbers = #tpu.dot_dimension_numbers<[1], [0], [0], [1], [0, 0, 1, 1], [], []>} : vector<8x128xbf16>, vector<128x128xbf16>, vector<8x128xf32> -> vector<8x128xf32>
    %17 = vector.broadcast %14 : vector<1x128xf32> to vector<8x128xf32>
    %18 = arith.addf %16, %17 : vector<8x128xf32>
    %cst_12 = arith.constant 0.00999999977 : f32
    %19 = vector.broadcast %cst_12 : f32 to vector<8x128xf32>
    %20 = arith.mulf %19, %18 : vector<8x128xf32>
    %21 = arith.maximumf %18, %20 : vector<8x128xf32>
    %c2 = arith.constant 2 : index
    %c0_13 = arith.constant 0 : index
    %c0_14 = arith.constant 0 : index
    %22 = vector.load %arg1[%c2, %c0_13, %c0_14] : memref<4x128x128xbf16, #tpu.memory_space<vmem>>, vector<1x128x128xbf16>
    %23 = vector.shape_cast %22 : vector<1x128x128xbf16> to vector<128x128xbf16>
    %c2_15 = arith.constant 2 : index
    %c0_16 = arith.constant 0 : index
    %24 = vector.load %arg2[%c2_15, %c0_16] : memref<4x128xf32, #tpu.memory_space<vmem>>, vector<1x128xf32>
    %25 = arith.truncf %21 : vector<8x128xf32> to vector<8x128xbf16>
    %cst_17 = arith.constant dense<0.000000e+00> : vector<8x128xf32>
    %26 = tpu.matmul %25, %23, %cst_17 {dimension_numbers = #tpu.dot_dimension_numbers<[1], [0], [0], [1], [0, 0, 1, 1], [], []>} : vector<8x128xbf16>, vector<128x128xbf16>, vector<8x128xf32> -> vector<8x128xf32>
    %27 = vector.broadcast %24 : vector<1x128xf32> to vector<8x128xf32>
    %28 = arith.addf %26, %27 : vector<8x128xf32>
    %cst_18 = arith.constant 0.00999999977 : f32
    %29 = vector.broadcast %cst_18 : f32 to vector<8x128xf32>
    %30 = arith.mulf %29, %28 : vector<8x128xf32>
    %31 = arith.maximumf %28, %30 : vector<8x128xf32>
    %c3 = arith.constant 3 : index
    %c0_19 = arith.constant 0 : index
    %c0_20 = arith.constant 0 : index
    %32 = vector.load %arg1[%c3, %c0_19, %c0_20] : memref<4x128x128xbf16, #tpu.memory_space<vmem>>, vector<1x128x128xbf16>
    %33 = vector.shape_cast %32 : vector<1x128x128xbf16> to vector<128x128xbf16>
    %c3_21 = arith.constant 3 : index
    %c0_22 = arith.constant 0 : index
    %34 = vector.load %arg2[%c3_21, %c0_22] : memref<4x128xf32, #tpu.memory_space<vmem>>, vector<1x128xf32>
    %35 = arith.truncf %31 : vector<8x128xf32> to vector<8x128xbf16>
    %cst_23 = arith.constant dense<0.000000e+00> : vector<8x128xf32>
    %36 = tpu.matmul %35, %33, %cst_23 {dimension_numbers = #tpu.dot_dimension_numbers<[1], [0], [0], [1], [0, 0, 1, 1], [], []>} : vector<8x128xbf16>, vector<128x128xbf16>, vector<8x128xf32> -> vector<8x128xf32>
    %37 = vector.broadcast %34 : vector<1x128xf32> to vector<8x128xf32>
    %38 = arith.addf %36, %37 : vector<8x128xf32>
    %c0_24 = arith.constant 0 : index
    %c0_25 = arith.constant 0 : index
    %39 = vector.load %arg3[%c0_24, %c0_25] : memref<8x128xf32, #tpu.memory_space<vmem>>, vector<8x128xf32>
    tpu.vector_store %arg3[%c0_24, %c0_25], %38 {strides = array<i32>} : memref<8x128xf32, #tpu.memory_space<vmem>>, vector<8x128xf32>,
    return
  }
}

</mosaic_0001>

<bundles_post_ra>
// kernel: deep_q_network.1
= control target key start
LH: loop header
LB: loop body
LE: loop exit
PB: predicated region body
PF: predicated region fallthrough
CT: control target
= control target key end

     0   :  { %8 = vsyncpa [#allocation3], 0  ;;  %s843_s0 = inlined_call_operand.vmem [shape: f32[8,128], index: 0, kind: input, shape index: {}]   ;;  %s844_s1 = inlined_call_operand.hbm [shape: bf16[4,128,128], index: 1, kind: input, shape index: {}]   ;;  %s845_s2 = inlined_call_operand.vmem [shape: f32[4,128], index: 2, kind: input, shape index: {}]   ;;  %s846_s3 = inlined_call_operand.hbm [shape: f32[8,128], index: 3, kind: output, shape index: {}]  }
   0x1   :  { %9 = vsyncpa [#allocation4], 0  ;;  %s738_s12 = smov [#allocation2]   ;;  %s690_s16 = scalar_lea.hbm %s844_s1, 4096 }
   0x2   :  { %s17_s13 = sshll.u32 %s738_s12, 4  ;;  %p691_p0 = scmp.ne.s32.totalorder %s844_s1, %s690_s16  ;;  %s18_s13 = int_to_ptr.vmem [resolvable:$true] %s17_s13 }
   0x3   :  { %p694_p1 = scmp.lt.u32.totalorder %s690_s16, %s844_s1 }
   0x5   :  { %p696_p2 = pnand %p694_p1, %p691_p0 }
   0x7   :  { %699 = shalt.err (!%p696_p2)
}
   0x8   :  { %s700_s21 = scalar_lea.vmem %s18_s13, 4096  ;;  %p705_p4 = scmp.lt.s32.totalorder %s18_s13, %s18_s13 }
   0x9   :  { %p701_p3 = scmp.ne.s32.totalorder %s18_s13, %s700_s21  ;;  %p706_p5 = scmp.lt.s32.totalorder %s700_s21, %s700_s21 }
   0xb   :  { %p707_p6 = por %p706_p5, %p705_p4 }
   0xd   :  { %p708_p7 = pnand %p707_p6, %p701_p3 }
   0xf   :  { %711 = shalt.err (!%p708_p7)
}
  0x10   :  { %s739_s22 = smov 64   ;;  %s740_s23 = smov 4  }
  0x11   :  { %23 = dma.hbm_to_vmem [thread:$0]  %s844_s1, 4096, %s18_s13, [#allocation3], %s739_s22, %s739_s22, %s740_s23  }
  0x12   :  { %734 = dma.done.wait [#allocation3], 4096  }
  0x13   :  { %735 = vsyncadd [#allocation3], 4294963200  ;;  %v741_v0 = vmov 0.0   ;;  %vm742_vm0 = vmmov 0   ;;  %v656_v1 = vld [vmem:[#allocation2] sm:$0xff]   ;;  %v657_v2 = vld [vmem:[#allocation2 + $0x8] sm:$0xff]  }
  0x14   :  { %570 = vmatprep.subr.bf16.mxu0 %v741_v0  ;;  %586 = vmatprep.mubr.msk.bf16.mxu0 %vm742_vm0, %v741_v0  ;;  %v658_v3 = vld [vmem:[#allocation2 + $0x10] sm:$0xff]   ;;  %v30_v4 = vld [vmem:[%s843_s0] sm:$0xff]  ;;  %v664_v5 = vld [vmem:[#allocation2 + $0x40] sm:$0xff]   ;;  %s743_s7 = smov [#allocation5]  }
  0x15   :  { %590 = vmatprep.subr.bf16.mxu1 %v741_v0  ;;  %606 = vmatprep.mubr.msk.bf16.mxu1 %vm742_vm0, %v741_v0  ;;  %688 = vlog2.f32 %v30_v4  ;;  %v659_v6 = vld [vmem:[#allocation2 + $0x18] sm:$0xff]   ;;  %v665_v7 = vld [vmem:[#allocation2 + $0x48] sm:$0xff]   ;;  %v660_v8 = vld [vmem:[#allocation2 + $0x20] sm:$0xff]   ;;  %s489_s8 = sshll.u32 %s743_s7, 4  ;;  %s490_s8 = int_to_ptr.vmem [resolvable:$true] %s489_s8 }
  0x16   :  { %571 = vmatpush3.bf16.msra.mxu0 %v656_v1  ;;  %591 = vmatpush3.bf16.msra.mxu1 %v664_v5  ;;  %v666_v9 = vld [vmem:[#allocation2 + $0x50] sm:$0xff]   ;;  %v661_v10 = vld [vmem:[#allocation2 + $0x28] sm:$0xff]   ;;  %v667_v11 = vld [vmem:[#allocation2 + $0x58] sm:$0xff]   ;;  %s712_s9 = scalar_lea.vmem %s490_s8, 128  ;;  %p717_p9 = scmp.lt.s32.totalorder %s490_s8, %s490_s8 }
  0x17   :  { %572 = vmatprep.subr.bf16.mxu0 %v741_v0  ;;  %592 = vmatprep.subr.bf16.mxu1 %v741_v0  ;;  %v662_v13 = vld [vmem:[#allocation2 + $0x30] sm:$0xff]   ;;  %v668_v15 = vld [vmem:[#allocation2 + $0x60] sm:$0xff]   ;;  %v663_v16 = vld [vmem:[#allocation2 + $0x38] sm:$0xff]   ;;  %p713_p8 = scmp.ne.s32.totalorder %s490_s8, %s712_s9  ;;  %p718_p10 = scmp.lt.s32.totalorder %s712_s9, %s712_s9 }
  0x18   :  { %v669_v17 = vld [vmem:[#allocation2 + $0x68] sm:$0xff]   ;;  %v670_v19 = vld [vmem:[#allocation2 + $0x70] sm:$0xff]   ;;  %v671_v20 = vld [vmem:[#allocation2 + $0x78] sm:$0xff]  }
  0x19   :  { %v672_v21 = vld [vmem:[#allocation2 + $0x80] sm:$0xff]   ;;  %v673_v22 = vld [vmem:[#allocation2 + $0x88] sm:$0xff]   ;;  %v674_v23 = vld [vmem:[#allocation2 + $0x90] sm:$0xff]   ;;  %p719_p11 = por %p718_p10, %p717_p9 }
  0x1a   :  { %573 = vmatpush3.bf16.msra.mxu0 %v657_v2  ;;  %593 = vmatpush3.bf16.msra.mxu1 %v665_v7  ;;  %v675_v24 = vld [vmem:[#allocation2 + $0x98] sm:$0xff]   ;;  %v676_v25 = vld [vmem:[#allocation2 + $0xa0] sm:$0xff]   ;;  %v677_v26 = vld [vmem:[#allocation2 + $0xa8] sm:$0xff]  }
  0x1b   :  { %574 = vmatprep.subr.bf16.mxu0 %v741_v0  ;;  %594 = vmatprep.subr.bf16.mxu1 %v741_v0  ;;  %v498_v27 = vld [vmem:[%s845_s2] ss:$0 sm:$0xff]  ;;  %v678_v36 = vld [vmem:[#allocation2 + $0xb0] sm:$0xff]   ;;  %v680_v38 = vld [vmem:[#allocation2 + $0xc0] sm:$0xff]   ;;  %p720_p12 = pnand %p719_p11, %p713_p8 }
  0x1c   :  { %v679_v37 = vld [vmem:[#allocation2 + $0xb8] sm:$0xff]   ;;  %v681_v39 = vld [vmem:[#allocation2 + $0xc8] sm:$0xff]   ;;  %v682_v40 = vld [vmem:[#allocation2 + $0xd0] sm:$0xff]  }
  0x1d   :  { %v683_v41 = vld [vmem:[#allocation2 + $0xd8] sm:$0xff]   ;;  %v684_v42 = vld [vmem:[#allocation2 + $0xe0] sm:$0xff]   ;;  %v685_v43 = vld [vmem:[#allocation2 + $0xe8] sm:$0xff]  }
  0x1e   :  { %575 = vmatpush3.bf16.msra.mxu0 %v658_v3  ;;  %595 = vmatpush3.bf16.msra.mxu1 %v666_v9  ;;  %v507_v44 = vld [vmem:[%s845_s2 + $0x1] ss:$0 sm:$0xff]  ;;  %v686_v53 = vld [vmem:[#allocation2 + $0xf0] sm:$0xff]   ;;  %v516_v55 = vld [vmem:[%s845_s2 + $0x2] ss:$0 sm:$0xff] }
  0x1f   :  { %576 = vmatprep.subr.bf16.mxu0 %v741_v0  ;;  %v689_v12 = vpop.eup %688  ;;  %596 = vmatprep.subr.bf16.mxu1 %v741_v0  ;;  %v687_v54 = vld [vmem:[#allocation2 + $0xf8] sm:$0xff]  }
  0x20   :  { %v32_v14 = vmul.f32 0.6931472, %v689_v12  ;;  %v525_v1 = vld [vmem:[%s845_s2 + $0x3] ss:$0 sm:$0xff] }
  0x22   :  { %577 = vmatpush3.bf16.msra.mxu0 %v659_v6  ;;  %597 = vmatpush3.bf16.msra.mxu1 %v667_v11  ;;  %v50_v18 = vpack.c.bf16 %v32_v14, %v32_v14 }
  0x23   :  { %578 = vmatprep.subr.bf16.mxu0 %v741_v0  ;;  %598 = vmatprep.subr.bf16.mxu1 %v741_v0 }
  0x26   :  { %579 = vmatpush3.bf16.msra.mxu0 %v660_v8  ;;  %599 = vmatpush3.bf16.msra.mxu1 %v668_v15 }
  0x27   :  { %580 = vmatprep.subr.bf16.mxu0 %v741_v0  ;;  %600 = vmatprep.subr.bf16.mxu1 %v741_v0 }
  0x2a   :  { %581 = vmatpush3.bf16.msra.mxu0 %v661_v10  ;;  %601 = vmatpush3.bf16.msra.mxu1 %v669_v17 }
  0x2b   :  { %582 = vmatprep.subr.bf16.mxu0 %v741_v0  ;;  %602 = vmatprep.subr.bf16.mxu1 %v741_v0 }
  0x2e   :  { %583 = vmatpush3.bf16.msra.mxu0 %v662_v13  ;;  %603 = vmatpush3.bf16.msra.mxu1 %v670_v19 }
  0x2f   :  { %584 = vmatprep.subr.bf16.mxu0 %v741_v0  ;;  %604 = vmatprep.subr.bf16.mxu1 %v741_v0 }
  0x32   :  { %585 = vmatpush3.bf16.msra.mxu0 %v663_v16  ;;  %605 = vmatpush3.bf16.msra.mxu1 %v671_v20 }
  0x33   :  { %610 = vmatprep.subr.bf16.mxu0 %v741_v0  ;;  %630 = vmatprep.subr.bf16.mxu1 %v741_v0 }
  0x35   :  { %587 = vmatmul.mubr.bf16.vlgmr.msra.gmra.mrb[0].mxu0 %v50_v18 }
  0x36   :  { %626 = vmatprep.mubr.msk.bf16.mxu0 %vm742_vm0, %v741_v0  ;;  %611 = vmatpush3.bf16.msra.mxu0 %v672_v21 }
  0x37   :  { %612 = vmatprep.subr.bf16.mxu0 %v741_v0 }
  0x3a   :  { %613 = vmatpush3.bf16.msra.mxu0 %v673_v22 }
  0x3b   :  { %614 = vmatprep.subr.bf16.mxu0 %v741_v0 }
  0x3e   :  { %615 = vmatpush3.bf16.msra.mxu0 %v674_v23 }
  0x3f   :  { %616 = vmatprep.subr.bf16.mxu0 %v741_v0 }
  0x42   :  { %617 = vmatpush3.bf16.msra.mxu0 %v675_v24 }
  0x43   :  { %618 = vmatprep.subr.bf16.mxu0 %v741_v0 }
  0x46   :  { %619 = vmatpush3.bf16.msra.mxu0 %v676_v25 }
  0x47   :  { %620 = vmatprep.subr.bf16.mxu0 %v741_v0 }
  0x4a   :  { %621 = vmatpush3.bf16.msra.mxu0 %v677_v26 }
  0x4b   :  { %622 = vmatprep.subr.bf16.mxu0 %v741_v0 }
  0x4e   :  { %623 = vmatpush3.bf16.msra.mxu0 %v678_v36 }
  0x4f   :  { %624 = vmatprep.subr.bf16.mxu0 %v741_v0 }
  0x52   :  { %625 = vmatpush3.bf16.msra.mxu0 %v679_v37 }
 0x108   :  { %v137_v28 = vpop.f32.mrb[0].mxu0 }
 0x109   :  { %v138_v29 = vadd.f32 %v498_v27, %v137_v28  ;;  %v588_v30 = vpop.f32.mrb[1].mxu0 }
 0x10a   :  { %v140_v31 = vpop.f32.mrb[2].mxu0 }
 0x10b   :  { %v143_v32 = vmul.f32 0.01, %v138_v29  ;;  %v589_v33 = vpop.f32.mrb[3].mxu0 }
 0x10d   :  { %v144_v34 = vmax.f32 %v138_v29, %v143_v32 }
 0x10f   :  { %v163_v35 = vpack.c.bf16 %v144_v34, %v144_v34 }
 0x111   :  { %607 = vmatmul.mubr.bf16.vlgmr.msra.gmra.mrb[0].mxu1 %v163_v35 }
 0x112   :  { %646 = vmatprep.mubr.msk.bf16.mxu1 %vm742_vm0, %v741_v0  ;;  %631 = vmatpush3.bf16.msra.mxu1 %v680_v38 }
 0x113   :  { %632 = vmatprep.subr.bf16.mxu1 %v741_v0 }
 0x116   :  { %633 = vmatpush3.bf16.msra.mxu1 %v681_v39 }
 0x117   :  { %634 = vmatprep.subr.bf16.mxu1 %v741_v0 }
 0x11a   :  { %635 = vmatpush3.bf16.msra.mxu1 %v682_v40 }
 0x11b   :  { %636 = vmatprep.subr.bf16.mxu1 %v741_v0 }
 0x11e   :  { %637 = vmatpush3.bf16.msra.mxu1 %v683_v41 }
 0x11f   :  { %638 = vmatprep.subr.bf16.mxu1 %v741_v0 }
 0x122   :  { %639 = vmatpush3.bf16.msra.mxu1 %v684_v42 }
 0x123   :  { %640 = vmatprep.subr.bf16.mxu1 %v741_v0 }
 0x126   :  { %641 = vmatpush3.bf16.msra.mxu1 %v685_v43 }
 0x127   :  { %642 = vmatprep.subr.bf16.mxu1 %v741_v0 }
 0x12a   :  { %643 = vmatpush3.bf16.msra.mxu1 %v686_v53 }
 0x12b   :  { %644 = vmatprep.subr.bf16.mxu1 %v741_v0 }
 0x12e   :  { %645 = vmatpush3.bf16.msra.mxu1 %v687_v54 }
 0x1e4   :  { %v250_v45 = vpop.f32.mrb[0].mxu1 }
 0x1e5   :  { %v251_v46 = vadd.f32 %v507_v44, %v250_v45  ;;  %v608_v47 = vpop.f32.mrb[1].mxu1 }
 0x1e6   :  { %v253_v48 = vpop.f32.mrb[2].mxu1 }
 0x1e7   :  { %v256_v49 = vmul.f32 0.01, %v251_v46  ;;  %v609_v50 = vpop.f32.mrb[3].mxu1 }
 0x1e9   :  { %v257_v51 = vmax.f32 %v251_v46, %v256_v49 }
 0x1eb   :  { %v276_v52 = vpack.c.bf16 %v257_v51, %v257_v51 }
 0x1ed   :  { %627 = vmatmul.mubr.bf16.vlgmr.msra.gmra.mrb[4].mxu0 %v276_v52 }
 0x2c0   :  { %v363_v56 = vpop.f32.mrb[4].mxu0 }
 0x2c1   :  { %v364_v57 = vadd.f32 %v516_v55, %v363_v56  ;;  %v628_v58 = vpop.f32.mrb[5].mxu0 }
 0x2c2   :  { %v366_v59 = vpop.f32.mrb[6].mxu0 }
 0x2c3   :  { %v369_v60 = vmul.f32 0.01, %v364_v57  ;;  %v629_v61 = vpop.f32.mrb[7].mxu0 }
 0x2c5   :  { %v370_v62 = vmax.f32 %v364_v57, %v369_v60 }
 0x2c7   :  { %v389_v63 = vpack.c.bf16 %v370_v62, %v370_v62 }
 0x2c9   :  { %647 = vmatmul.mubr.bf16.vlgmr.msra.gmra.mrb[4].mxu1 %v389_v63 }
 0x39c   :  { %v476_v0 = vpop.f32.mrb[4].mxu1 }
 0x39d   :  { %v477_v2 = vadd.f32 %v525_v1, %v476_v0  ;;  %v648_v3 = vpop.f32.mrb[5].mxu1 }
 0x39e   :  { %v479_v4 = vpop.f32.mrb[6].mxu1 }
 0x39f   :  { %482 = vst [vmem:[#allocation5] sm:$0xff] %v477_v2  ;;  %v649_v5 = vpop.f32.mrb[7].mxu1 }
 0x3a0   :  { %723 = shalt.err (!%p720_p12)
}
 0x3a1   :  { %s724_s2 = scalar_lea.hbm %s846_s3, 128 }
 0x3a2   :  { %p725_p13 = scmp.ne.s32.totalorder %s846_s3, %s724_s2  ;;  %p728_p0 = scmp.lt.u32.totalorder %s724_s2, %s846_s3 }
 0x3a4   :  { %p730_p1 = pnand %p728_p0, %p725_p13 }
 0x3a6   :  { %733 = shalt.err (!%p730_p1)
}
 0x3a7   :  { %492 = dma.vmem_to_hbm [thread:$0]  %s490_s8, 128, %s846_s3, [#allocation4]  }
 0x3a8   :  { %736 = dma.done.wait [#allocation4], 128  }
 0x3a9   :  { %737 = vsyncadd [#allocation4], 4294967168 }
 0x3aa   :  { %496 = vsyncpa [#allocation3], 1 }
 0x3ab   :  { %497 = vsyncpa [#allocation4], 1 }

</bundles_post_ra>
